<compile_context>
chip_gen: v7x
topology: tpu7x:2x2x1
jax: 0.10.0
libtpu: 0.0.40
codegen_flags: <defaults>
</compile_context>

<pallas_src>
import jax
import jax.numpy as jnp
from jax.experimental import pallas as pl
from jax.experimental.pallas import tpu as pltpu

FEATURE_DIM = 512      # base_encoder.fc.in_features default
HIDDEN_DIM = 512       # projector hidden width
PROJECTION_DIM = 128   # projection_dim default
NORM_EPS = 1e-12       # F.normalize default eps


def simclr_kernel(x_ref, we_ref, be_ref, w1_ref, b1_ref, w2_ref, b2_ref,
                  out_ref, pooled_acc):
    s = pl.program_id(1)

    @pl.when(s == 0)
    def _init():
        pooled_acc[...] = jnp.zeros_like(pooled_acc)

    # Spatial partial sum, accumulated in f32 (mean scale is folded into `we`).
    x = x_ref[...]                                              # (B_T, C, S_T) bf16
    pooled_acc[...] += jnp.sum(x.astype(jnp.float32), axis=-1)  # (B_T, C)

    @pl.when(s == pl.num_programs(1) - 1)
    def _finalize():
        pooled = pooled_acc[...]                                # (B_T, C) f32
        # ---- stand-in encoder head: Linear(C -> 512) (mean scale pre-folded)
        h = jnp.dot(pooled.astype(we_ref.dtype), we_ref[...],
                    preferred_element_type=jnp.float32) + be_ref[...]
        # ---- projector: Linear -> ReLU -> Linear (bf16 MXU, f32 accumulate)
        z1 = jnp.dot(h.astype(w1_ref.dtype), w1_ref[...],
                     preferred_element_type=jnp.float32) + b1_ref[...]
        z1 = jnp.maximum(z1, 0.0)
        z = jnp.dot(z1.astype(w2_ref.dtype), w2_ref[...],
                    preferred_element_type=jnp.float32) + b2_ref[...]
        # ---- F.normalize(z, dim=1): z / max(||z||_2, eps)
        norm = jnp.sqrt(jnp.sum(z * z, axis=1, keepdims=True))
        inv = pl.reciprocal(jnp.maximum(norm, NORM_EPS), approx=True)
        out_ref[...] = (z * inv).astype(out_ref.dtype)


def _pick_batch_tile(B):
    # Prefer 256 rows to fill the 2x256x256 MXU on v6e/v7x; fall back gracefully.
    for t in (256, 128, 64, 32, 16, 8):
        if t <= B and B % t == 0:
            return t
    return B


def _pick_spatial_tile(S, max_tile=2048):
    # Largest multiple of 128 (<= max_tile) that divides S; else full extent.
    if S % 128 != 0:
        return S
    best = 128
    t = 256
    while t <= min(S, max_tile):
        if S % t == 0:
            best = t
        t += 128
    return best


def simclr_forward(x_nchw, params, *, b_tile=None, s_tile=None):
    B, C, H, W = x_nchw.shape
    S = H * W
    b_tile = _pick_batch_tile(B) if b_tile is None else b_tile
    s_tile = _pick_spatial_tile(S) if s_tile is None else s_tile
    assert B % b_tile == 0 and S % s_tile == 0
    assert s_tile == S or s_tile % 128 == 0

    # Stream the dominant HBM term (x) in bf16; fold 1/(H*W) into we.
    x_flat = x_nchw.reshape(B, C, S).astype(jnp.bfloat16)
    we = (params["we"].astype(jnp.float32) / float(S)).astype(jnp.bfloat16)
    w1 = params["w1"].astype(jnp.bfloat16)
    w2 = params["w2"].astype(jnp.bfloat16)
    be = params["be"].astype(jnp.float32)
    b1 = params["b1"].astype(jnp.float32)
    b2 = params["b2"].astype(jnp.float32)

    grid = (B // b_tile, S // s_tile)

    x_spec = pl.BlockSpec((b_tile, C, s_tile), lambda b, s: (b, 0, s))

    def const_spec(shape):
        # Resident parameter: same block for every grid step -> fetched once.
        return pl.BlockSpec(shape, lambda b, s: (0, 0))

    out_spec = pl.BlockSpec((b_tile, PROJECTION_DIM), lambda b, s: (b, 0))

    # VMEM budget: double-buffered x tiles + resident params + out + margin.
    x_tile_bytes = b_tile * C * s_tile * 2
    param_bytes = ((we.size + w1.size + w2.size) * 2
                   + (be.size + b1.size + b2.size) * 4)
    out_bytes = b_tile * PROJECTION_DIM * 4
    vmem_limit = int(min(96 << 20,
                         2 * x_tile_bytes + 2 * param_bytes + 2 * out_bytes
                         + (8 << 20)))

    cost = pl.CostEstimate(
        flops=int(2 * B * (C * FEATURE_DIM + FEATURE_DIM * HIDDEN_DIM
                           + HIDDEN_DIM * PROJECTION_DIM) + B * C * S),
        transcendentals=int(B),
        bytes_accessed=int(x_flat.size * 2 + param_bytes
                           + B * PROJECTION_DIM * 4),
    )

    return pl.pallas_call(
        simclr_kernel,
        out_shape=jax.ShapeDtypeStruct((B, PROJECTION_DIM), jnp.float32),
        grid_spec=pltpu.PrefetchScalarGridSpec(
            num_scalar_prefetch=0,
            grid=grid,
            in_specs=[
                x_spec,
                const_spec((C, FEATURE_DIM)),
                const_spec((1, FEATURE_DIM)),
                const_spec((FEATURE_DIM, HIDDEN_DIM)),
                const_spec((1, HIDDEN_DIM)),
                const_spec((HIDDEN_DIM, PROJECTION_DIM)),
                const_spec((1, PROJECTION_DIM)),
            ],
            out_specs=out_spec,
            scratch_shapes=[pltpu.VMEM((b_tile, C), jnp.float32)],
        ),
        compiler_params=pltpu.CompilerParams(
            dimension_semantics=("parallel", "arbitrary"),
            vmem_limit_bytes=vmem_limit,
        ),
        cost_estimate=cost,
    )(x_flat, we, be, w1, b1, w2, b2)


def init_params(key, in_channels):
    ks = jax.random.split(key, 6)

    def lin(kw, kb, fan_in, fan_out):
        bound = 1.0 / jnp.sqrt(fan_in)
        w = jax.random.uniform(kw, (fan_in, fan_out), jnp.float32, -bound, bound)
        b = jax.random.uniform(kb, (1, fan_out), jnp.float32, -bound, bound)
        return w, b

    we, be = lin(ks[0], ks[1], in_channels, FEATURE_DIM)
    w1, b1 = lin(ks[2], ks[3], FEATURE_DIM, HIDDEN_DIM)
    w2, b2 = lin(ks[4], ks[5], HIDDEN_DIM, PROJECTION_DIM)
    return {"we": we, "be": be, "w1": w1, "b1": b1, "w2": w2, "b2": b2}


def simclr_reference(x_nchw, params):
    # pure-JAX f32 reference for correctness checking
    B, C, H, W = x_nchw.shape
    pooled = jnp.mean(x_nchw.astype(jnp.float32).reshape(B, C, H * W), axis=-1)
    h = pooled @ params["we"] + params["be"]
    z1 = jnp.maximum(h @ params["w1"] + params["b1"], 0.0)
    z = z1 @ params["w2"] + params["b2"]
    norm = jnp.sqrt(jnp.sum(z * z, axis=1, keepdims=True))
    return z / jnp.maximum(norm, NORM_EPS)


if __name__ == "__main__":
    key = jax.random.PRNGKey(0)
    kx, kp = jax.random.split(key)

    B, C, H, W = 2, 4, 16, 16
    x = jax.random.normal(kx, (B, C, H, W), dtype=jnp.float32)
    params = init_params(kp, C)

    # s_tile=128 -> 2 spatial grid steps, exercising the accumulate/finalize path.
    out = simclr_forward(x, params, s_tile=128)
    out = jax.block_until_ready(out)

    ref = simclr_reference(x, params)
    assert out.shape == (B, PROJECTION_DIM)
    # bf16 input/weight streaming -> loose tolerance vs the f32 reference.
    assert jnp.allclose(out, ref, atol=5e-2, rtol=5e-2), "mismatch vs reference"
    # rows should be unit-norm
    assert jnp.allclose(jnp.linalg.norm(out, axis=1), 1.0, atol=5e-3)

    print("KERNEL_OK")
</pallas_src>

<mosaic_0001>
module attributes {stable_mosaic.version = 11 : i64} {
  func.func @simclr_kernel(%arg0: i32, %arg1: i32, %arg2: memref<2x4x128xbf16, #tpu.memory_space<vmem>>, %arg3: memref<4x512xbf16, #tpu.memory_space<vmem>>, %arg4: memref<1x512xf32, #tpu.memory_space<vmem>>, %arg5: memref<512x512xbf16, #tpu.memory_space<vmem>>, %arg6: memref<1x512xf32, #tpu.memory_space<vmem>>, %arg7: memref<512x128xbf16, #tpu.memory_space<vmem>>, %arg8: memref<1x128xf32, #tpu.memory_space<vmem>>, %arg9: memref<2x128xf32, #tpu.memory_space<vmem>>, %arg10: memref<2x4xf32, #tpu.memory_space<vmem>>) attributes {dimension_semantics = [#tpu.dimension_semantics<parallel>, #tpu.dimension_semantics<arbitrary>], iteration_bounds = array<i64: 1, 2>, scalar_prefetch = 0 : i64, scratch_operands = 1 : i64, tpu.core_type = #tpu.core_type<tc>, window_params = [{transform_indices = @transform_0, window_bounds = array<i64: 2, 4, 128>}, {pipeline_mode = #tpu.pipeline_mode<synchronous>, transform_indices = @transform_1, window_bounds = array<i64: 4, 512>}, {pipeline_mode = #tpu.pipeline_mode<synchronous>, transform_indices = @transform_2, window_bounds = array<i64: 1, 512>}, {pipeline_mode = #tpu.pipeline_mode<synchronous>, transform_indices = @transform_3, window_bounds = array<i64: 512, 512>}, {pipeline_mode = #tpu.pipeline_mode<synchronous>, transform_indices = @transform_4, window_bounds = array<i64: 1, 512>}, {pipeline_mode = #tpu.pipeline_mode<synchronous>, transform_indices = @transform_5, window_bounds = array<i64: 512, 128>}, {pipeline_mode = #tpu.pipeline_mode<synchronous>, transform_indices = @transform_6, window_bounds = array<i64: 1, 128>}, {transform_indices = @transform_7, window_bounds = array<i64: 2, 128>}]} {
    %c0_i32 = arith.constant 0 : i32
    %0 = arith.cmpi eq, %arg1, %c0_i32 : i32
    %1 = arith.extui %0 : i1 to i32
    %c0_i32_0 = arith.constant 0 : i32
    %2 = arith.cmpi ne, %1, %c0_i32_0 : i32
    scf.if %2 {
      %cst_8 = arith.constant 0.000000e+00 : f32
      %12 = vector.broadcast %cst_8 : f32 to vector<2x4xf32>
      %c0_9 = arith.constant 0 : index
      %c0_10 = arith.constant 0 : index
      %13 = vector.load %arg10[%c0_9, %c0_10] : memref<2x4xf32, #tpu.memory_space<vmem>>, vector<2x4xf32>
      tpu.vector_store %arg10[%c0_9, %c0_10], %12 {strides = array<i32>} : memref<2x4xf32, #tpu.memory_space<vmem>>, vector<2x4xf32>,
    } else {
    }
    %c0 = arith.constant 0 : index
    %c0_1 = arith.constant 0 : index
    %c0_2 = arith.constant 0 : index
    %3 = vector.load %arg2[%c0, %c0_1, %c0_2] : memref<2x4x128xbf16, #tpu.memory_space<vmem>>, vector<2x4x128xbf16>
    %c0_3 = arith.constant 0 : index
    %c0_4 = arith.constant 0 : index
    %4 = vector.load %arg10[%c0_3, %c0_4] : memref<2x4xf32, #tpu.memory_space<vmem>>, vector<2x4xf32>
    %5 = arith.extf %3 : vector<2x4x128xbf16> to vector<2x4x128xf32>
    %cst = arith.constant dense<0.000000e+00> : vector<2x4xf32>
    %6 = vector.multi_reduction <add>, %5, %cst [2] : vector<2x4x128xf32> to vector<2x4xf32>
    %7 = arith.addf %4, %6 : vector<2x4xf32>
    %c0_5 = arith.constant 0 : index
    %c0_6 = arith.constant 0 : index
    %8 = vector.load %arg10[%c0_5, %c0_6] : memref<2x4xf32, #tpu.memory_space<vmem>>, vector<2x4xf32>
    tpu.vector_store %arg10[%c0_5, %c0_6], %7 {strides = array<i32>} : memref<2x4xf32, #tpu.memory_space<vmem>>, vector<2x4xf32>,
    %c1_i32 = arith.constant 1 : i32
    %9 = arith.cmpi eq, %arg1, %c1_i32 : i32
    %10 = arith.extui %9 : i1 to i32
    %c0_i32_7 = arith.constant 0 : i32
    %11 = arith.cmpi ne, %10, %c0_i32_7 : i32
    scf.if %11 {
      %c0_8 = arith.constant 0 : index
      %c0_9 = arith.constant 0 : index
      %12 = vector.load %arg10[%c0_8, %c0_9] : memref<2x4xf32, #tpu.memory_space<vmem>>, vector<2x4xf32>
      %13 = arith.truncf %12 : vector<2x4xf32> to vector<2x4xbf16>
      %c0_10 = arith.constant 0 : index
      %c0_11 = arith.constant 0 : index
      %14 = vector.load %arg3[%c0_10, %c0_11] : memref<4x512xbf16, #tpu.memory_space<vmem>>, vector<4x512xbf16>
      %cst_12 = arith.constant dense<0.000000e+00> : vector<2x512xf32>
      %15 = tpu.matmul %13, %14, %cst_12 {dimension_numbers = #tpu.dot_dimension_numbers<[1], [0], [0], [1], [0, 0, 1, 1], [], []>} : vector<2x4xbf16>, vector<4x512xbf16>, vector<2x512xf32> -> vector<2x512xf32>
      %c0_13 = arith.constant 0 : index
      %c0_14 = arith.constant 0 : index
      %16 = vector.load %arg4[%c0_13, %c0_14] : memref<1x512xf32, #tpu.memory_space<vmem>>, vector<1x512xf32>
      %17 = vector.broadcast %16 : vector<1x512xf32> to vector<2x512xf32>
      %18 = arith.addf %15, %17 : vector<2x512xf32>
      %19 = arith.truncf %18 : vector<2x512xf32> to vector<2x512xbf16>
      %c0_15 = arith.constant 0 : index
      %c0_16 = arith.constant 0 : index
      %20 = vector.load %arg5[%c0_15, %c0_16] : memref<512x512xbf16, #tpu.memory_space<vmem>>, vector<512x512xbf16>
      %cst_17 = arith.constant dense<0.000000e+00> : vector<2x512xf32>
      %21 = tpu.matmul %19, %20, %cst_17 {dimension_numbers = #tpu.dot_dimension_numbers<[1], [0], [0], [1], [0, 0, 1, 1], [], []>} : vector<2x512xbf16>, vector<512x512xbf16>, vector<2x512xf32> -> vector<2x512xf32>
      %c0_18 = arith.constant 0 : index
      %c0_19 = arith.constant 0 : index
      %22 = vector.load %arg6[%c0_18, %c0_19] : memref<1x512xf32, #tpu.memory_space<vmem>>, vector<1x512xf32>
      %23 = vector.broadcast %22 : vector<1x512xf32> to vector<2x512xf32>
      %24 = arith.addf %21, %23 : vector<2x512xf32>
      %cst_20 = arith.constant 0.000000e+00 : f32
      %25 = vector.broadcast %cst_20 : f32 to vector<2x512xf32>
      %26 = arith.maximumf %24, %25 : vector<2x512xf32>
      %27 = arith.truncf %26 : vector<2x512xf32> to vector<2x512xbf16>
      %c0_21 = arith.constant 0 : index
      %c0_22 = arith.constant 0 : index
      %28 = vector.load %arg7[%c0_21, %c0_22] : memref<512x128xbf16, #tpu.memory_space<vmem>>, vector<512x128xbf16>
      %cst_23 = arith.constant dense<0.000000e+00> : vector<2x128xf32>
      %29 = tpu.matmul %27, %28, %cst_23 {dimension_numbers = #tpu.dot_dimension_numbers<[1], [0], [0], [1], [0, 0, 1, 1], [], []>} : vector<2x512xbf16>, vector<512x128xbf16>, vector<2x128xf32> -> vector<2x128xf32>
      %c0_24 = arith.constant 0 : index
      %c0_25 = arith.constant 0 : index
      %30 = vector.load %arg8[%c0_24, %c0_25] : memref<1x128xf32, #tpu.memory_space<vmem>>, vector<1x128xf32>
      %31 = vector.broadcast %30 : vector<1x128xf32> to vector<2x128xf32>
      %32 = arith.addf %29, %31 : vector<2x128xf32>
      %33 = arith.mulf %32, %32 : vector<2x128xf32>
      %cst_26 = arith.constant dense<0.000000e+00> : vector<2xf32>
      %34 = vector.multi_reduction <add>, %33, %cst_26 [1] : vector<2x128xf32> to vector<2xf32>
      %35 = vector.shape_cast %34 : vector<2xf32> to vector<2x1xf32>
      %36 = math.sqrt %35 : vector<2x1xf32>
      %cst_27 = arith.constant 9.99999996E-13 : f32
      %37 = vector.broadcast %cst_27 : f32 to vector<2x1xf32>
      %38 = arith.maximumf %36, %37 : vector<2x1xf32>
      %39 = tpu.reciprocal %38 {approx = true} : vector<2x1xf32> -> vector<2x1xf32>
      %40 = vector.broadcast %39 : vector<2x1xf32> to vector<2x128xf32>
      %41 = arith.mulf %32, %40 : vector<2x128xf32>
      %c0_28 = arith.constant 0 : index
      %c0_29 = arith.constant 0 : index
      %42 = vector.load %arg9[%c0_28, %c0_29] : memref<2x128xf32, #tpu.memory_space<vmem>>, vector<2x128xf32>
      tpu.vector_store %arg9[%c0_28, %c0_29], %41 {strides = array<i32>} : memref<2x128xf32, #tpu.memory_space<vmem>>, vector<2x128xf32>,
    } else {
    }
    return
  }
  func.func @transform_0(%arg0: i32, %arg1: i32) -> (i32, i32, i32) {
    %c0_i32 = arith.constant 0 : i32
    %c0_i32_0 = arith.constant 0 : i32
    return %arg0, %c0_i32, %arg1 : i32, i32, i32
  }
  func.func @transform_1(%arg0: i32, %arg1: i32) -> (i32, i32) {
    %c0_i32 = arith.constant 0 : i32
    %c0_i32_0 = arith.constant 0 : i32
    %c0_i32_1 = arith.constant 0 : i32
    return %c0_i32, %c0_i32_0 : i32, i32
  }
  func.func @transform_2(%arg0: i32, %arg1: i32) -> (i32, i32) {
    %c0_i32 = arith.constant 0 : i32
    %c0_i32_0 = arith.constant 0 : i32
    %c0_i32_1 = arith.constant 0 : i32
    return %c0_i32, %c0_i32_0 : i32, i32
  }
  func.func @transform_3(%arg0: i32, %arg1: i32) -> (i32, i32) {
    %c0_i32 = arith.constant 0 : i32
    %c0_i32_0 = arith.constant 0 : i32
    %c0_i32_1 = arith.constant 0 : i32
    return %c0_i32, %c0_i32_0 : i32, i32
  }
  func.func @transform_4(%arg0: i32, %arg1: i32) -> (i32, i32) {
    %c0_i32 = arith.constant 0 : i32
    %c0_i32_0 = arith.constant 0 : i32
    %c0_i32_1 = arith.constant 0 : i32
    return %c0_i32, %c0_i32_0 : i32, i32
  }
  func.func @transform_5(%arg0: i32, %arg1: i32) -> (i32, i32) {
    %c0_i32 = arith.constant 0 : i32
    %c0_i32_0 = arith.constant 0 : i32
    %c0_i32_1 = arith.constant 0 : i32
    return %c0_i32, %c0_i32_0 : i32, i32
  }
  func.func @transform_6(%arg0: i32, %arg1: i32) -> (i32, i32) {
    %c0_i32 = arith.constant 0 : i32
    %c0_i32_0 = arith.constant 0 : i32
    %c0_i32_1 = arith.constant 0 : i32
    return %c0_i32, %c0_i32_0 : i32, i32
  }
  func.func @transform_7(%arg0: i32, %arg1: i32) -> (i32, i32) {
    %c0_i32 = arith.constant 0 : i32
    %c0_i32_0 = arith.constant 0 : i32
    return %arg0, %c0_i32 : i32, i32
  }
}

</mosaic_0001>

<bundles_post_ra>
// kernel: tpu_custom_call.1
= control target key start
LH: loop header
LB: loop body
LE: loop exit
PB: predicated region body
PF: predicated region fallthrough
CT: control target
= control target key end

     0   :  { %s3076_s0 = inlined_call_operand.hbm [shape: bf16[2,4,256], index: 0, kind: input, shape index: {}]   ;;  %s3077_s1 = inlined_call_operand.hbm [shape: bf16[4,512], index: 1, kind: input, shape index: {}]   ;;  %s3078_s2 = inlined_call_operand.vmem [shape: f32[1,512], index: 2, kind: input, shape index: {}]   ;;  %s3079_s3 = inlined_call_operand.hbm [shape: bf16[512,512], index: 3, kind: input, shape index: {}]   ;;  %s3080_s4 = inlined_call_operand.vmem [shape: f32[1,512], index: 4, kind: input, shape index: {}]   ;;  %s3081_s5 = inlined_call_operand.hbm [shape: bf16[512,128], index: 5, kind: input, shape index: {}]   ;;  %s3082_s6 = inlined_call_operand.vmem [shape: f32[1,128], index: 6, kind: input, shape index: {}]   ;;  %s3083_s7 = inlined_call_operand.hbm [shape: f32[2,128], index: 7, kind: output, shape index: {}]  }
   0x1   :  { %3091 = sst [smem:[#allocation16_spill]] %s3077_s1 }
   0x2   :  { %3092 = sst [smem:[#allocation17_spill]] %s3083_s7 }
   0x3   :  { %12 = vsyncpa [#allocation4], 0 }
   0x4   :  { %14 = vsyncpa [#allocation4 + $0x1], 0 }
   0x5   :  { %15 = vsyncpa [#allocation7], 0 }
   0x6   :  { %16 = vsyncpa [#allocation10], 0 }
   0x7   :  { %17 = vsyncpa [#allocation5], 0  ;;  %s2786_s24 = smov 0   ;;  %s2788_s25 = smov 0  }
   0x8   :  { %s2790_s26 = smov 0   ;;  %s2792_s27 = smov 0  }
   0x9   :  { %s2794_s28 = smov 0   ;;  %s2796_s29 = smov 0  }
   0xa LB: > { %s3089_s30 = sadd.s32 4294967295, %s2730_s29   ;;  %p51_p0 = scmp.ne.s32.totalorder %s2718_s26, %s2714_s25  ;;  %s2730_s29 = sphi %s2796_s29, %s23_s29   ;;  %s2726_s28 = sphi %s2794_s28, %s3111_s28   ;;  %s2722_s27 = sphi %s2792_s27, %s3110_s27   ;;  %s2718_s26 = sphi %s2790_s26, %s3109_s26   ;;  %s2714_s25 = sphi %s2788_s25, %s3108_s25   ;;  %s2710_s24 = sphi %s2786_s24, %s3107_s24  }
   0xb   : > { %p52_p1 = scmp.eq.s32.totalorder %s2730_s29, 0  ;;  %p57_p2 = scmp.ne.s32.totalorder %s2714_s25, %s2710_s24 }
   0xc   : > { %p2821_p3 = scmp.eq.s32.totalorder %s3089_s30, 0  ;;  %p1958_p4 = scmp.ge.s32.totalorder %s2730_s29, 1 }
   0xd   : > { %p53_p5 = por %p52_p1, %p51_p0  ;;  %p220_p6 = scmp.lt.s32.totalorder %s2730_s29, 3 }
   0xe   : > { %s3093_s8 = scalar_select %p2821_p3, 1, 0 }
   0xf   : > { %p2829_p7 = por %p2821_p3, %p57_p2  ;;  %p2833_p8 = pnand %p1958_p4, %p220_p6 }
  0x10   : > { %s2732_s11 = smov [#allocation6]   ;;  %p2232_p10 = scmp.lt.s32.totalorder %s2730_s29, 2 }
  0x11   : > { %s3094_s9 = scalar_select %p2829_p7, 1, 0 }
  0x12   : > { %s3095_s10 = scalar_select %p2833_p8, 1, 0 }
  0x13   : > { %s233_s12 = sshll.u32 %s2732_s11, 4  ;;  %p2215_p9 = pneg %p2833_p8  ;;  %s234_s12 = int_to_ptr.vmem [resolvable:$true] %s233_s12 }
  0x14   : > { %s2733_s14 = smov [#allocation8]   ;;  %p2846_p12 = pnand %p2232_p10, %p53_p5 }
  0x15   : > { %p2842_p11 = pnand %p2215_p9, %p2821_p3  ;;  %s246_s15 = sshll.u32 %s2733_s14, 4  ;;  %s2850_s15 = int_to_ptr.vmem [resolvable:$true] %s246_s15 }
  0x16   : > { %s3097_s16 = scalar_select %p2846_p12, 1, 0 }
  0x17   : > { %s3098_s1 = sld [smem:[#allocation16_spill]]  ;;  %p2860_p0 = pneg %p2842_p11 }
  0x1d   : > { %s2528_s19 = scalar_lea.hbm %s3098_s1, 128 }
  0x1e   : > { %p2529_p13 = scmp.ne.s32.totalorder %s3098_s1, %s2528_s19  ;;  %p2535_p4 = scmp.lt.u32.totalorder %s2528_s19, %s3098_s1 }
  0x20   : > { %p2531_p1 = pnand %p2860_p0, %p2529_p13 }
  0x22   : > { %p2532_p2 = pneg %p2531_p1 }
  0x24   : > { %p2537_p5 = pnand %p2535_p4, %p2532_p2 }
  0x26   : > { %2540 = shalt.err (!%p2537_p5)
}
  0x27   : > { %s2541_s11 = scalar_lea.vmem %s234_s12, 128  ;;  %p2549_p3 = scmp.lt.s32.totalorder %s234_s12, %s234_s12 }
  0x28   : > { %p2542_p6 = scmp.ne.s32.totalorder %s234_s12, %s2541_s11  ;;  %p2550_p7 = scmp.lt.s32.totalorder %s2541_s11, %s2541_s11 }
  0x2a   : > { %p2544_p9 = pnand %p2542_p6, %p2860_p0  ;;  %p2551_p8 = por %p2550_p7, %p2549_p3 }
  0x2c   : > { %p2545_p10 = pneg %p2544_p9 }
  0x2e   : > { %p2552_p12 = pnand %p2551_p8, %p2545_p10 }
  0x30   : > { %2555 = shalt.err (!%p2552_p12)
}
  0x31   : > { %2218 = dma.hbm_to_vmem [thread:$0]  (!%p2842_p11), %s3098_s1, 128, %s234_s12, [#allocation7]  }
  0x32   : > { %s2556_s20 = scalar_lea.hbm %s3079_s3, 16384 }
  0x33   : > { %p2557_p13 = scmp.ne.s32.totalorder %s3079_s3, %s2556_s20  ;;  %p2563_p7 = scmp.lt.u32.totalorder %s2556_s20, %s3079_s3 }
  0x35   : > { %p2559_p1 = pnand %p2557_p13, %p2860_p0 }
  0x37   : > { %p2560_p3 = pneg %p2559_p1 }
  0x39   : > { %p2565_p8 = pnand %p2563_p7, %p2560_p3 }
  0x3b   : > { %2568 = shalt.err (!%p2565_p8)
}
  0x3c   : > { %s2569_s12 = scalar_lea.vmem %s2850_s15, 16384  ;;  %p2577_p5 = scmp.lt.s32.totalorder %s2850_s15, %s2850_s15 }
  0x3d   : > { %p2570_p12 = scmp.ne.s32.totalorder %s2850_s15, %s2569_s12  ;;  %p2578_p6 = scmp.lt.s32.totalorder %s2569_s12, %s2569_s12 }
  0x3f   : > { %p2572_p2 = pnand %p2570_p12, %p2860_p0  ;;  %p2579_p9 = por %p2578_p6, %p2577_p5 }
  0x41   : > { %p2573_p4 = pneg %p2572_p2 }
  0x43   : > { %p2580_p10 = pnand %p2579_p9, %p2573_p4 }
  0x45   : > { %2583 = shalt.err (!%p2580_p10)
}
  0x46   : > { %s2734_s14 = smov 256   ;;  %s2735_s17 = smov 16  }
  0x47   : > { %2221 = dma.hbm_to_vmem [thread:$0]  (!%p2842_p11), %s3079_s3, 16384, %s2850_s15, [#allocation7], %s2734_s14, %s2734_s14, %s2735_s17  }
  0x48   : > { %s2736_s20 = smov [#allocation9]   ;;  %s2584_s11 = scalar_lea.hbm %s3081_s5, 4096 }
  0x49   : > { %s262_s21 = sshll.u32 %s2736_s20, 4  ;;  %p2585_p13 = scmp.ne.s32.totalorder %s3081_s5, %s2584_s11  ;;  %s263_s21 = int_to_ptr.vmem [resolvable:$true] %s262_s21 }
  0x4a   : > { %p2591_p7 = scmp.lt.u32.totalorder %s2584_s11, %s3081_s5 }
  0x4b   : > { %p2587_p1 = pnand %p2585_p13, %p2860_p0 }
  0x4d   : > { %p2588_p3 = pneg %p2587_p1 }
  0x4f   : > { %p2593_p8 = pnand %p2591_p7, %p2588_p3 }
  0x51   : > { %2596 = shalt.err (!%p2593_p8)
}
  0x52   : > { %s2597_s15 = scalar_lea.vmem %s263_s21, 4096  ;;  %p2605_p5 = scmp.lt.s32.totalorder %s263_s21, %s263_s21 }
  0x53   : > { %p2598_p12 = scmp.ne.s32.totalorder %s263_s21, %s2597_s15  ;;  %p2606_p6 = scmp.lt.s32.totalorder %s2597_s15, %s2597_s15 }
  0x55   : > { %p2600_p2 = pnand %p2598_p12, %p2860_p0  ;;  %p2607_p9 = por %p2606_p6, %p2605_p5 }
  0x57   : > { %p2601_p4 = pneg %p2600_p2 }
  0x59   : > { %p2608_p10 = pnand %p2607_p9, %p2601_p4 }
  0x5b   : > { %2611 = shalt.err (!%p2608_p10)
}
  0x5c   : > { %s2737_s30 = smov 64   ;;  %s2738_s1 = smov 4  }
  0x5d   : > { %2224 = dma.hbm_to_vmem [thread:$0]  (!%p2842_p11), %s3081_s5, 4096, %s263_s21, [#allocation10], %s2737_s30, %s2737_s30, %s2738_s1  }
  0x5e   : > { %s44_s14 = sadd.s32 1, %s2718_s26  ;;  %s32_s17 = sadd.s32 1, %s2726_s28 }
  0x5f   : > { %s279_s18 = sand.u32 1, %s2718_s26   ;;  %p33_p0 = scmp.ge.s32.totalorder %s32_s17, 2 }
  0x60   : > { %s1963_s19 = sshll.u32 %s279_s18, 2  ;;  %s1964_s20 = sshll.u32 %s2726_s28, 5 }
  0x61   : > { %s3113_s17 = smov (%p33_p0, %s32_s17), 0  ;;  %s2928_s13 = scalar_lea.hbm %s3076_s0, %s1964_s20 }
  0x62   : > { %s40_s21 = ssub.s32 %s2726_s28, %s3113_s17  ;;  %s283_s11 = scalar_lea.vmem [#allocation3], %s1963_s19 }
  0x63   : > { %s292_s12 = sshll.u32 %s283_s11, 4  ;;  %p42_p11 = scmp.eq.s32.totalorder %s40_s21, 0  ;;  %s2932_s12 = int_to_ptr.vmem [resolvable:$true] %s292_s12 }
  0x64   : > { %s2937_s1 = scalar_lea.sflag [#allocation4], %s279_s18  ;;  %s2612_s7 = scalar_lea.hbm %s2928_s13, 64 }
  0x65   : > { %s2935_s15 = scalar_select %p42_p11, %s2718_s26, %s44_s14  }
  0x66   : > { %p2613_p13 = scmp.ne.s32.totalorder %s2928_s13, %s2612_s7  ;;  %p3100_p1 = scmp.ne.s32.totalorder %s3097_s16, 0 }
  0x67   : > { %s2617_s19 = scalar_lea.hbm %s3076_s0, 128  ;;  %p2618_p12 = scmp.lt.u32.totalorder %s2928_s13, %s3076_s0 }
  0x68   : > { %p2614_p3 = pneg %p3100_p1  ;;  %p2619_p2 = scmp.lt.u32.totalorder %s2617_s19, %s2612_s7 }
  0x69   : > { %p2621_p5 = scmp.lt.u32.totalorder %s2612_s7, %s2928_s13 }
  0x6a   : > { %p2615_p7 = pnand %p2614_p3, %p2613_p13  ;;  %p2620_p4 = por %p2619_p2, %p2618_p12 }
  0x6c   : > { %p2616_p8 = pneg %p2615_p7  ;;  %p2622_p6 = por %p2621_p5, %p2620_p4 }
  0x6e   : > { %p2623_p9 = pnand %p2622_p6, %p2616_p8 }
  0x70   : > { %2626 = shalt.err (!%p2623_p9)
}
  0x71   : > { %s2627_s14 = scalar_lea.vmem %s2932_s12, 64  ;;  %s2739_s18 = smov [#allocation3]  }
  0x72   : > { %p2628_p10 = scmp.ne.s32.totalorder %s2932_s12, %s2627_s14  ;;  %s2632_s21 = sshll.u32 %s2739_s18, 4  ;;  %s2633_s21 = int_to_ptr.vmem [resolvable:$false] %s2632_s21 }
  0x73   : > { %s2634_s11 = scalar_lea.vmem %s2633_s21, 128  ;;  %p2635_p13 = scmp.lt.s32.totalorder %s2932_s12, %s2633_s21 }
  0x74   : > { %p2630_p0 = pnand %p2628_p10, %p2614_p3  ;;  %p2636_p7 = scmp.lt.s32.totalorder %s2634_s11, %s2627_s14 }
  0x76   : > { %p2631_p11 = pneg %p2630_p0  ;;  %p2637_p12 = por %p2636_p7, %p2635_p13 }
  0x78   : > { %p2638_p2 = pnand %p2637_p12, %p2631_p11 }
  0x7a   : > { %2641 = shalt.err (!%p2638_p2)
}
  0x7b   : > { %s2740_s7 = smov 32   ;;  %s2741_s22 = smov 2  }
  0x7c   : > { %2228 = dma.hbm_to_vmem [thread:$0]  (!%p3100_p1), %s2928_s13, 64, %s2932_s12, %s2937_s1, %s2737_s30, %s2740_s7, %s2741_s22  }
  0x7d   : > { %p3101_p3 = scmp.ne.s32.totalorder %s3095_s10, 0 }
  0x7e   : > { %s306_s20 = sand.u32 (!%p3101_p3), 1, %s2714_s25   ;;  %p3102_p8 = scmp.ne.s32.totalorder (!%p3101_p3), %s3094_s9, 0 }
  0x7f   : > { %304 = sbr.rel (%p3101_p3) target bundleno = 1242 (0x4da), region = 48  ;;  %s1966_s19 = sshll.u32 (!%p3101_p3), %s306_s20, 2 }
  0x80   : > { %s307_s23 = scalar_lea.sflag (!%p3101_p3), [#allocation4], %s306_s20  ;;  %s310_s24 = scalar_lea.vmem (!%p3101_p3), [#allocation3], %s1966_s19 }
  0x86   : > { %2693 = dma.done.wait (%p3102_p8), %s307_s23, 64  }
  0x87   : > { %2695 = vsyncadd (%p3102_p8), %s307_s23, 4294967232  ;;  %p3103_p4 = scmp.ne.s32.totalorder %s3093_s8, 0 }
  0x89   : > { %2697 = dma.done.wait (%p3103_p4), [#allocation7], 16512  }
  0x8a   : > { %2699 = vsyncadd (%p3103_p4), [#allocation7], 4294950784 }
  0x8b   : > { %2701 = dma.done.wait (%p3103_p4), [#allocation10], 4096  }
  0x8c   : > { %2703 = vsyncadd (%p3103_p4), [#allocation10], 4294963200  ;;  %p1970_p1 = scmp.ne.s32.totalorder %s2722_s27, 0 }
  0x8d   : > { %vm354_vm0 = vcmask (!%p1970_p1), 25600   ;;  %v2742_v0 = vmov (!%p1970_p1), 0.0  }
  0x8e   : > { %353 = sbr.rel (%p1970_p1) target bundleno = 149 (0x95), region = 68  ;;  %355 = vst.msk [vmem:[#allocation2] sm:$0x3] (!%p1970_p1), %vm354_vm0, %v2742_v0 }
  0x95 PF: > { %v356_v1 = vld [vmem:[%s310_s24] sm:$0x3]  ;;  %vm361_vm1 = vcmask 1043456   ;;  %v357_v2 = vld [vmem:[%s310_s24 + $0x2] sm:$0x3]  ;;  %v370_v7 = vlaneseq  ;;  %vm380_vm2 = vcmask 1041409  }
  0x96   : > { %v359_v3 = vunpack.c.l.bf16 %v356_v1  ;;  %v360_v4 = vunpack.c.l.bf16 %v357_v2  ;;  %v358_v14 = vld [vmem:[#allocation2] sm:$0x3]  ;;  %vm384_vm3 = vcmask 25600   ;;  %p1971_p5 = scmp.ne.s32.totalorder %s2722_s27, 1 }
  0x97   : > { %v371_v8 = vand.u32 127, %v370_v7  ;;  %v2982_v9 = vshrl.u32 %v370_v7, 7  ;;  %v2743_v18 = vmov (!%p1971_p5), 1983009808   ;;  %v2744_v20 = vmov (!%p1971_p5), 0   ;;  %v392_v21 = vld [vmem:[#allocation6] sm:$0xff] (!%p1971_p5) }
  0x98   : > { %v362_v5 = vsel %vm361_vm1, %v359_v3, 0.0  ;;  %v365_v6 = vsel %vm361_vm1, %v360_v4, 0.0  ;;  %v418_v19 = vunpack.c.l.s4 (!%p1971_p5), %v2743_v18  ;;  %482 = vmatprep.mubr.bf16.mxu0 (!%p1971_p5), %v2744_v20  ;;  %523 = vmatprep.mubr.bf16.mxu1 (!%p1971_p5), %v2744_v20  ;;  %v416_v23 = vcombine.high (!%p1971_p5), %v392_v21, %v392_v21  ;;  %v2302_v28 = vld [vmem:[#allocation8 + $0x4] ss:$16 sps:$4 sm:$0xff] (!%p1971_p5)   ;;  %v2305_v33 = vld [vmem:[#allocation8 + $0xc] ss:$16 sps:$4 sm:$0xff] (!%p1971_p5)  }
  0x99   : > { %363 = vadd.xlane.f32.xlu0 %v362_v5  ;;  %v374_v11 = vsub.s32 %v371_v8, %v2982_v9  ;;  %vm437_vm4 = vcmask (!%p1971_p5), 1041408   ;;  %v2300_v35 = vld [vmem:[#allocation8] ss:$16 sps:$4 sm:$0xff] (!%p1971_p5)   ;;  %v2303_v36 = vld [vmem:[#allocation8 + $0x8] ss:$16 sps:$4 sm:$0xff] (!%p1971_p5)   ;;  %vm433_vm5 = vcmask (!%p1971_p5), 31744  }
  0x9a   : > { %v419_v22 = vunpack.c.0.s8 (!%p1971_p5), %v418_v19  ;;  %v2308_v37 = vld [vmem:[#allocation8 + $0x24] ss:$16 sps:$4 sm:$0xff] (!%p1971_p5)   ;;  %v2311_v38 = vld [vmem:[#allocation8 + $0x2c] ss:$16 sps:$4 sm:$0xff] (!%p1971_p5)   ;;  %v2306_v39 = vld [vmem:[#allocation8 + $0x20] ss:$16 sps:$4 sm:$0xff] (!%p1971_p5)  }
  0x9b   : > { %v2309_v40 = vld [vmem:[#allocation8 + $0x28] ss:$16 sps:$4 sm:$0xff] (!%p1971_p5)   ;;  %v2314_v41 = vld [vmem:[#allocation8 + $0x44] ss:$16 sps:$4 sm:$0xff] (!%p1971_p5)   ;;  %v2317_v42 = vld [vmem:[#allocation8 + $0x4c] ss:$16 sps:$4 sm:$0xff] (!%p1971_p5)  }
  0x9c   : > { %v422_v24 = vsub.s32 (!%p1971_p5), %v419_v22, %v2982_v9  ;;  %v2312_v43 = vld [vmem:[#allocation8 + $0x40] ss:$16 sps:$4 sm:$0xff] (!%p1971_p5)   ;;  %v2315_v44 = vld [vmem:[#allocation8 + $0x48] ss:$16 sps:$4 sm:$0xff] (!%p1971_p5)   ;;  %v2320_v45 = vld [vmem:[#allocation8 + $0x64] ss:$16 sps:$4 sm:$0xff] (!%p1971_p5)  }
  0x9d   : > { %366 = vadd.xlane.f32.xlu0 %v365_v6  ;;  %v2323_v46 = vld [vmem:[#allocation8 + $0x6c] ss:$16 sps:$4 sm:$0xff] (!%p1971_p5)   ;;  %v2318_v47 = vld [vmem:[#allocation8 + $0x60] ss:$16 sps:$4 sm:$0xff] (!%p1971_p5)   ;;  %v2321_v48 = vld [vmem:[#allocation8 + $0x68] ss:$16 sps:$4 sm:$0xff] (!%p1971_p5)  }
  0x9e   : > { %v423_v25 = vrot.slane (!%p1971_p5), %v392_v21, %v422_v24  ;;  %v430_v27 = vrot.slane (!%p1971_p5), %v416_v23, %v422_v24  ;;  %v2326_v49 = vld [vmem:[#allocation8 + $0x84] ss:$16 sps:$4 sm:$0xff] (!%p1971_p5)   ;;  %v2329_v50 = vld [vmem:[#allocation8 + $0x8c] ss:$16 sps:$4 sm:$0xff] (!%p1971_p5)   ;;  %v2324_v51 = vld [vmem:[#allocation8 + $0x80] ss:$16 sps:$4 sm:$0xff] (!%p1971_p5)  }
  0x9f   : > { %v2327_v52 = vld [vmem:[#allocation8 + $0x88] ss:$16 sps:$4 sm:$0xff] (!%p1971_p5)   ;;  %v2332_v53 = vld [vmem:[#allocation8 + $0xa4] ss:$16 sps:$4 sm:$0xff] (!%p1971_p5)   ;;  %v2335_v54 = vld [vmem:[#allocation8 + $0xac] ss:$16 sps:$4 sm:$0xff] (!%p1971_p5)  }
  0xa0   : > { %v431_v29 = vcombine.high (!%p1971_p5), %v423_v25, %v423_v25  ;;  %v439_v30 = vsel (!%p1971_p5), %vm437_vm4, %v423_v25, 0  ;;  %v432_v31 = vcombine.high (!%p1971_p5), %v430_v27, %v430_v27  ;;  %v445_v32 = vsel (!%p1971_p5), %vm437_vm4, %v430_v27, 0  ;;  %v2330_v55 = vld [vmem:[#allocation8 + $0xa0] ss:$16 sps:$4 sm:$0xff] (!%p1971_p5)   ;;  %v2333_v56 = vld [vmem:[#allocation8 + $0xa8] ss:$16 sps:$4 sm:$0xff] (!%p1971_p5)  }
  0xa1   : > { %v2338_v57 = vld [vmem:[#allocation8 + $0xc4] ss:$16 sps:$4 sm:$0xff] (!%p1971_p5)   ;;  %v2341_v58 = vld [vmem:[#allocation8 + $0xcc] ss:$16 sps:$4 sm:$0xff] (!%p1971_p5)   ;;  %v2336_v59 = vld [vmem:[#allocation8 + $0xc0] ss:$16 sps:$4 sm:$0xff] (!%p1971_p5)  }
  0xa2   : > { %1972 = vmatprep.subr.msk.bf16.mxu0 (!%p1971_p5), %vm437_vm4, %v431_v29  ;;  %1974 = vmatprep.subr.msk.bf16.mxu1 (!%p1971_p5), %vm437_vm4, %v432_v31  ;;  %v2339_v60 = vld [vmem:[#allocation8 + $0xc8] ss:$16 sps:$4 sm:$0xff] (!%p1971_p5)   ;;  %v2344_v61 = vld [vmem:[#allocation8 + $0xe4] ss:$16 sps:$4 sm:$0xff] (!%p1971_p5)   ;;  %v2347_v62 = vld [vmem:[#allocation8 + $0xec] ss:$16 sps:$4 sm:$0xff] (!%p1971_p5)  }
  0xa3   : > { %451 = vmatpush1.bf16.msra.mxu0 (!%p1971_p5), %v439_v30  ;;  %492 = vmatpush1.bf16.msra.mxu1 (!%p1971_p5), %v445_v32  ;;  %v2342_v63 = vld [vmem:[#allocation8 + $0xe0] ss:$16 sps:$4 sm:$0xff] (!%p1971_p5)   ;;  %v2345_v0 = vld [vmem:[#allocation8 + $0xe8] ss:$16 sps:$4 sm:$0xff] (!%p1971_p5)   ;;  %v2350_v1 = vld [vmem:[#allocation8 + $0x104] ss:$16 sps:$4 sm:$0xff] (!%p1971_p5)  }
  0xa4   : > { %1326 = vmatprep.subr.bf16.mxu0 (!%p1971_p5), %v2302_v28  ;;  %1408 = vmatprep.subr.bf16.mxu1 (!%p1971_p5), %v2305_v33  ;;  %v2353_v2 = vld [vmem:[#allocation8 + $0x10c] ss:$16 sps:$4 sm:$0xff] (!%p1971_p5)   ;;  %v2348_v3 = vld [vmem:[#allocation8 + $0x100] ss:$16 sps:$4 sm:$0xff] (!%p1971_p5)   ;;  %v2351_v4 = vld [vmem:[#allocation8 + $0x108] ss:$16 sps:$4 sm:$0xff] (!%p1971_p5)  }
  0xa5   : > { %v2356_v5 = vld [vmem:[#allocation8 + $0x124] ss:$16 sps:$4 sm:$0xff] (!%p1971_p5)   ;;  %v2359_v6 = vld [vmem:[#allocation8 + $0x12c] ss:$16 sps:$4 sm:$0xff] (!%p1971_p5)   ;;  %v2354_v7 = vld [vmem:[#allocation8 + $0x120] ss:$16 sps:$4 sm:$0xff] (!%p1971_p5)  }
  0xa6   : > { %v2357_v8 = vld [vmem:[#allocation8 + $0x128] ss:$16 sps:$4 sm:$0xff] (!%p1971_p5)   ;;  %v2374_v18 = vld [vmem:[#allocation8 + $0x184] ss:$16 sps:$4 sm:$0xff] (!%p1971_p5)   ;;  %v2377_v19 = vld [vmem:[#allocation8 + $0x18c] ss:$16 sps:$4 sm:$0xff] (!%p1971_p5)  }
  0xa7   : > { %v2372_v20 = vld [vmem:[#allocation8 + $0x180] ss:$16 sps:$4 sm:$0xff] (!%p1971_p5)   ;;  %v2375_v21 = vld [vmem:[#allocation8 + $0x188] ss:$16 sps:$4 sm:$0xff] (!%p1971_p5)   ;;  %v2380_v22 = vld [vmem:[#allocation8 + $0x1a4] ss:$16 sps:$4 sm:$0xff] (!%p1971_p5)  }
  0xa8   : > { %v2383_v23 = vld [vmem:[#allocation8 + $0x1ac] ss:$16 sps:$4 sm:$0xff] (!%p1971_p5)   ;;  %v2378_v24 = vld [vmem:[#allocation8 + $0x1a0] ss:$16 sps:$4 sm:$0xff] (!%p1971_p5)   ;;  %v2381_v25 = vld [vmem:[#allocation8 + $0x1a8] ss:$16 sps:$4 sm:$0xff] (!%p1971_p5)  }
  0xa9   : > { %v2389_v27 = vld [vmem:[#allocation8 + $0x1cc] ss:$16 sps:$4 sm:$0xff] (!%p1971_p5)   ;;  %v2384_v28 = vld [vmem:[#allocation8 + $0x1c0] ss:$16 sps:$4 sm:$0xff] (!%p1971_p5)   ;;  %v2387_v29 = vld [vmem:[#allocation8 + $0x1c8] ss:$16 sps:$4 sm:$0xff] (!%p1971_p5)  }
  0xaa   : > { %v2392_v30 = vld [vmem:[#allocation8 + $0x1e4] ss:$16 sps:$4 sm:$0xff] (!%p1971_p5)   ;;  %v2395_v31 = vld [vmem:[#allocation8 + $0x1ec] ss:$16 sps:$4 sm:$0xff] (!%p1971_p5)   ;;  %v2390_v32 = vld [vmem:[#allocation8 + $0x1e0] ss:$16 sps:$4 sm:$0xff] (!%p1971_p5)  }
  0xab   : > { %v2393_v33 = vld [vmem:[#allocation8 + $0x1e8] ss:$16 sps:$4 sm:$0xff] (!%p1971_p5)  }
 0x126   : > { %v364_v10 = vpop.xlane.xlu0 %363 }
 0x127   : > { %v375_v13 = vrot.slane %v364_v10, %v374_v11  ;;  %v2362_v10 = vld [vmem:[#allocation8 + $0x144] ss:$16 sps:$4 sm:$0xff] (!%p1971_p5)  }
 0x12a   : > { %v367_v12 = vpop.xlane.xlu0 %366  ;;  %389 = sbr.rel (%p1971_p5) target bundleno = 1211 (0x4bb), region = 72 }
 0x12b   : > { %v379_v15 = vrot.slane %v367_v12, %v374_v11  ;;  %v2365_v11 = vld [vmem:[#allocation8 + $0x14c] ss:$16 sps:$4 sm:$0xff] (!%p1971_p5)   ;;  %v2360_v12 = vld [vmem:[#allocation8 + $0x140] ss:$16 sps:$4 sm:$0xff] (!%p1971_p5)  }
 0x12d   : > { %v381_v16 = vsel %vm380_vm2, %v379_v15, %v375_v13  ;;  %v2363_v13 = vld [vmem:[#allocation8 + $0x148] ss:$16 sps:$4 sm:$0xff] (!%p1971_p5)   ;;  %v2371_v15 = vld [vmem:[#allocation8 + $0x16c] ss:$16 sps:$4 sm:$0xff] (!%p1971_p5)  }
 0x12e   : > { %v383_v17 = vadd.f32 %v381_v16, %v358_v14  ;;  %v2368_v14 = vld [vmem:[#allocation8 + $0x164] ss:$16 sps:$4 sm:$0xff] (!%p1971_p5)   ;;  %v2366_v16 = vld [vmem:[#allocation8 + $0x160] ss:$16 sps:$4 sm:$0xff] (!%p1971_p5)  }
 0x130   : > { %385 = vst.msk [vmem:[#allocation2] sm:$0x3] %vm384_vm3, %v383_v17  ;;  %v2369_v17 = vld [vmem:[#allocation8 + $0x168] ss:$16 sps:$4 sm:$0xff] (!%p1971_p5)  }
 0x137   : > { %v390_v26 = vld [vmem:[#allocation2] sm:$0x3] }
 0x138   : > { %v391_v34 = vpack.c.bf16 %v390_v26, %v390_v26  ;;  %v2386_v26 = vld [vmem:[#allocation8 + $0x1c4] ss:$16 sps:$4 sm:$0xff]  }
 0x13a   : > { %1973 = vmatmul.mubr.msk.bf16.vlgmr.msra.gmra.mrb[0].mxu0 %vm433_vm5, %v391_v34  ;;  %1975 = vmatmul.mubr.msk.bf16.vlgmr.msra.gmra.mrb[0].mxu1 %vm433_vm5, %v391_v34  ;;  %v2398_v34 = vld [vmem:[#allocation8 + $0x204] ss:$16 sps:$4 sm:$0xff]  }
 0x13b   : > { %1327 = vmatpush1.bf16.msra.mxu0 %v2300_v35  ;;  %1409 = vmatpush1.bf16.msra.mxu1 %v2303_v36  ;;  %v2401_v35 = vld [vmem:[#allocation8 + $0x20c] ss:$16 sps:$4 sm:$0xff]   ;;  %v397_v36 = vsub.s32 0, %v2982_v9 }
 0x13c   : > { %1328 = vmatprep.subr.bf16.mxu0 %v2308_v37  ;;  %1410 = vmatprep.subr.bf16.mxu1 %v2311_v38  ;;  %v2995_v37 = vld [vmem:[%s3078_s2] sm:$0xf]  ;;  %v401_v38 = vsub.s32 1, %v2982_v9 }
 0x13f   : > { %1329 = vmatpush1.bf16.msra.mxu0 %v2306_v39  ;;  %1411 = vmatpush1.bf16.msra.mxu1 %v2309_v40  ;;  %v409_v39 = vsub.s32 3, %v2982_v9  ;;  %v398_v40 = vrot.slane %v2995_v37, %v397_v36 }
 0x140   : > { %1330 = vmatprep.subr.bf16.mxu0 %v2314_v41  ;;  %1412 = vmatprep.subr.bf16.mxu1 %v2317_v42  ;;  %v402_v41 = vrot.slane %v2995_v37, %v401_v38 }
 0x141   : > { %v410_v42 = vrot.slane %v2995_v37, %v409_v39 }
 0x143   : > { %1331 = vmatpush1.bf16.msra.mxu0 %v2312_v43  ;;  %1413 = vmatpush1.bf16.msra.mxu1 %v2315_v44 }
 0x144   : > { %1332 = vmatprep.subr.bf16.mxu0 %v2320_v45  ;;  %1414 = vmatprep.subr.bf16.mxu1 %v2323_v46 }
 0x147   : > { %1333 = vmatpush1.bf16.msra.mxu0 %v2318_v47  ;;  %1415 = vmatpush1.bf16.msra.mxu1 %v2321_v48 }
 0x148   : > { %1334 = vmatprep.subr.bf16.mxu0 %v2326_v49  ;;  %1416 = vmatprep.subr.bf16.mxu1 %v2329_v50 }
 0x14b   : > { %1335 = vmatpush1.bf16.msra.mxu0 %v2324_v51  ;;  %1417 = vmatpush1.bf16.msra.mxu1 %v2327_v52 }
 0x14c   : > { %1336 = vmatprep.subr.bf16.mxu0 %v2332_v53  ;;  %1418 = vmatprep.subr.bf16.mxu1 %v2335_v54 }
 0x14f   : > { %1337 = vmatpush1.bf16.msra.mxu0 %v2330_v55  ;;  %1419 = vmatpush1.bf16.msra.mxu1 %v2333_v56  ;;  %v2396_v55 = vld [vmem:[#allocation8 + $0x200] ss:$16 sps:$4 sm:$0xff]   ;;  %v2399_v56 = vld [vmem:[#allocation8 + $0x208] ss:$16 sps:$4 sm:$0xff]  }
 0x150   : > { %1338 = vmatprep.subr.bf16.mxu0 %v2338_v57  ;;  %1420 = vmatprep.subr.bf16.mxu1 %v2341_v58  ;;  %v2404_v58 = vld [vmem:[#allocation8 + $0x224] ss:$16 sps:$4 sm:$0xff]  }
 0x153   : > { %1339 = vmatpush1.bf16.msra.mxu0 %v2336_v59  ;;  %1421 = vmatpush1.bf16.msra.mxu1 %v2339_v60  ;;  %v2407_v59 = vld [vmem:[#allocation8 + $0x22c] ss:$16 sps:$4 sm:$0xff]  }
 0x154   : > { %1340 = vmatprep.subr.bf16.mxu0 %v2344_v61  ;;  %1422 = vmatprep.subr.bf16.mxu1 %v2347_v62  ;;  %v2402_v61 = vld [vmem:[#allocation8 + $0x220] ss:$16 sps:$4 sm:$0xff]   ;;  %v2405_v62 = vld [vmem:[#allocation8 + $0x228] ss:$16 sps:$4 sm:$0xff]  }
 0x157   : > { %1341 = vmatpush1.bf16.msra.mxu0 %v2342_v63  ;;  %1423 = vmatpush1.bf16.msra.mxu1 %v2345_v0  ;;  %v2410_v63 = vld [vmem:[#allocation8 + $0x244] ss:$16 sps:$4 sm:$0xff]   ;;  %v2413_v0 = vld [vmem:[#allocation8 + $0x24c] ss:$16 sps:$4 sm:$0xff]  }
 0x158   : > { %1342 = vmatprep.subr.bf16.mxu0 %v2350_v1  ;;  %1424 = vmatprep.subr.bf16.mxu1 %v2353_v2  ;;  %v2408_v1 = vld [vmem:[#allocation8 + $0x240] ss:$16 sps:$4 sm:$0xff]   ;;  %v2411_v2 = vld [vmem:[#allocation8 + $0x248] ss:$16 sps:$4 sm:$0xff]  }
 0x15b   : > { %1343 = vmatpush1.bf16.msra.mxu0 %v2348_v3  ;;  %1425 = vmatpush1.bf16.msra.mxu1 %v2351_v4  ;;  %v2416_v3 = vld [vmem:[#allocation8 + $0x264] ss:$16 sps:$4 sm:$0xff]   ;;  %v2419_v4 = vld [vmem:[#allocation8 + $0x26c] ss:$16 sps:$4 sm:$0xff]  }
 0x15c   : > { %1344 = vmatprep.subr.bf16.mxu0 %v2356_v5  ;;  %1426 = vmatprep.subr.bf16.mxu1 %v2359_v6  ;;  %v2414_v5 = vld [vmem:[#allocation8 + $0x260] ss:$16 sps:$4 sm:$0xff]   ;;  %v2417_v6 = vld [vmem:[#allocation8 + $0x268] ss:$16 sps:$4 sm:$0xff]  }
 0x15f   : > { %1345 = vmatpush1.bf16.msra.mxu0 %v2354_v7  ;;  %1427 = vmatpush1.bf16.msra.mxu1 %v2357_v8  ;;  %v2422_v7 = vld [vmem:[#allocation8 + $0x284] ss:$16 sps:$4 sm:$0xff]   ;;  %v2425_v8 = vld [vmem:[#allocation8 + $0x28c] ss:$16 sps:$4 sm:$0xff]  }
 0x160   : > { %1346 = vmatprep.subr.bf16.mxu0 %v2362_v10  ;;  %1428 = vmatprep.subr.bf16.mxu1 %v2365_v11  ;;  %v2420_v10 = vld [vmem:[#allocation8 + $0x280] ss:$16 sps:$4 sm:$0xff]   ;;  %v2423_v11 = vld [vmem:[#allocation8 + $0x288] ss:$16 sps:$4 sm:$0xff]  }
 0x163   : > { %1347 = vmatpush1.bf16.msra.mxu0 %v2360_v12  ;;  %1429 = vmatpush1.bf16.msra.mxu1 %v2363_v13  ;;  %v2428_v12 = vld [vmem:[#allocation8 + $0x2a4] ss:$16 sps:$4 sm:$0xff]   ;;  %v2431_v13 = vld [vmem:[#allocation8 + $0x2ac] ss:$16 sps:$4 sm:$0xff]  }
 0x164   : > { %1348 = vmatprep.subr.bf16.mxu0 %v2368_v14  ;;  %1430 = vmatprep.subr.bf16.mxu1 %v2371_v15  ;;  %v2426_v14 = vld [vmem:[#allocation8 + $0x2a0] ss:$16 sps:$4 sm:$0xff]   ;;  %v2429_v15 = vld [vmem:[#allocation8 + $0x2a8] ss:$16 sps:$4 sm:$0xff]  }
 0x167   : > { %1349 = vmatpush1.bf16.msra.mxu0 %v2366_v16  ;;  %1431 = vmatpush1.bf16.msra.mxu1 %v2369_v17  ;;  %v2434_v16 = vld [vmem:[#allocation8 + $0x2c4] ss:$16 sps:$4 sm:$0xff]   ;;  %v2437_v17 = vld [vmem:[#allocation8 + $0x2cc] ss:$16 sps:$4 sm:$0xff]  }
 0x168   : > { %1350 = vmatprep.subr.bf16.mxu0 %v2374_v18  ;;  %1432 = vmatprep.subr.bf16.mxu1 %v2377_v19  ;;  %v2432_v18 = vld [vmem:[#allocation8 + $0x2c0] ss:$16 sps:$4 sm:$0xff]   ;;  %v2435_v19 = vld [vmem:[#allocation8 + $0x2c8] ss:$16 sps:$4 sm:$0xff]  }
 0x16b   : > { %1351 = vmatpush1.bf16.msra.mxu0 %v2372_v20  ;;  %1433 = vmatpush1.bf16.msra.mxu1 %v2375_v21  ;;  %v2440_v20 = vld [vmem:[#allocation8 + $0x2e4] ss:$16 sps:$4 sm:$0xff]   ;;  %v2443_v21 = vld [vmem:[#allocation8 + $0x2ec] ss:$16 sps:$4 sm:$0xff]  }
 0x16c   : > { %1352 = vmatprep.subr.bf16.mxu0 %v2380_v22  ;;  %1434 = vmatprep.subr.bf16.mxu1 %v2383_v23  ;;  %v2438_v22 = vld [vmem:[#allocation8 + $0x2e0] ss:$16 sps:$4 sm:$0xff]   ;;  %v2441_v23 = vld [vmem:[#allocation8 + $0x2e8] ss:$16 sps:$4 sm:$0xff]  }
 0x16f   : > { %1353 = vmatpush1.bf16.msra.mxu0 %v2378_v24  ;;  %1435 = vmatpush1.bf16.msra.mxu1 %v2381_v25  ;;  %v2446_v24 = vld [vmem:[#allocation8 + $0x304] ss:$16 sps:$4 sm:$0xff]   ;;  %v2449_v25 = vld [vmem:[#allocation8 + $0x30c] ss:$16 sps:$4 sm:$0xff]  }
 0x170   : > { %1354 = vmatprep.subr.bf16.mxu0 %v2386_v26  ;;  %1436 = vmatprep.subr.bf16.mxu1 %v2389_v27  ;;  %v2444_v26 = vld [vmem:[#allocation8 + $0x300] ss:$16 sps:$4 sm:$0xff]   ;;  %v2447_v27 = vld [vmem:[#allocation8 + $0x308] ss:$16 sps:$4 sm:$0xff]  }
 0x173   : > { %1355 = vmatpush1.bf16.msra.mxu0 %v2384_v28  ;;  %1437 = vmatpush1.bf16.msra.mxu1 %v2387_v29  ;;  %v2452_v28 = vld [vmem:[#allocation8 + $0x324] ss:$16 sps:$4 sm:$0xff]   ;;  %v2455_v29 = vld [vmem:[#allocation8 + $0x32c] ss:$16 sps:$4 sm:$0xff]  }
 0x174   : > { %1356 = vmatprep.subr.bf16.mxu0 %v2392_v30  ;;  %1438 = vmatprep.subr.bf16.mxu1 %v2395_v31  ;;  %v2450_v30 = vld [vmem:[#allocation8 + $0x320] ss:$16 sps:$4 sm:$0xff]   ;;  %v2453_v31 = vld [vmem:[#allocation8 + $0x328] ss:$16 sps:$4 sm:$0xff]  }
 0x177   : > { %1357 = vmatpush1.bf16.msra.mxu0 %v2390_v32  ;;  %1439 = vmatpush1.bf16.msra.mxu1 %v2393_v33  ;;  %v2458_v32 = vld [vmem:[#allocation8 + $0x344] ss:$16 sps:$4 sm:$0xff]   ;;  %v2461_v33 = vld [vmem:[#allocation8 + $0x34c] ss:$16 sps:$4 sm:$0xff]  }
 0x178   : > { %1367 = vmatprep.subr.bf16.mxu0 %v2398_v34  ;;  %1449 = vmatprep.subr.bf16.mxu1 %v2401_v35  ;;  %v2456_v34 = vld [vmem:[#allocation8 + $0x340] ss:$16 sps:$4 sm:$0xff]   ;;  %v2459_v35 = vld [vmem:[#allocation8 + $0x348] ss:$16 sps:$4 sm:$0xff]  }
 0x20d   : > { %v484_v43 = vpop.f32.mrb[0].mxu0  ;;  %v3008_v44 = vpop.f32.mrb[0].mxu1 }
 0x20e   : > { %v485_v45 = vadd.f32 %v484_v43, %v398_v40  ;;  %v486_v46 = vpop.f32.mrb[1].mxu0  ;;  %v527_v47 = vpop.f32.mrb[1].mxu1  ;;  %v2464_v40 = vld [vmem:[#allocation8 + $0x364] ss:$16 sps:$4 sm:$0xff]   ;;  %v2465_v43 = vld [vmem:[#allocation8 + $0x368] ss:$16 sps:$4 sm:$0xff]  }
 0x20f   : > { %v487_v48 = vadd.f32 %v486_v46, %v402_v41  ;;  %v488_v49 = vpop.f32.mrb[2].mxu0  ;;  %v528_v50 = vadd.f32 %v527_v47, %v410_v42  ;;  %v529_v51 = vpop.f32.mrb[2].mxu1  ;;  %v2467_v41 = vld [vmem:[#allocation8 + $0x36c] ss:$16 sps:$4 sm:$0xff]   ;;  %v2462_v42 = vld [vmem:[#allocation8 + $0x360] ss:$16 sps:$4 sm:$0xff]  }
 0x210   : > { %v489_v52 = vpop.f32.mrb[3].mxu0  ;;  %v530_v53 = vpop.f32.mrb[3].mxu1  ;;  %v532_v57 = vpack.c.bf16 %v485_v45, %v485_v45  ;;  %v2470_v45 = vld [vmem:[#allocation8 + $0x384] ss:$16 sps:$4 sm:$0xff]   ;;  %v2473_v46 = vld [vmem:[#allocation8 + $0x38c] ss:$16 sps:$4 sm:$0xff]  }
 0x211   : > { %v533_v54 = vpack.c.bf16 %v487_v48, %v487_v48  ;;  %v535_v60 = vpack.c.bf16 %v528_v50, %v528_v50  ;;  %v2468_v47 = vld [vmem:[#allocation8 + $0x380] ss:$16 sps:$4 sm:$0xff]   ;;  %v2471_v48 = vld [vmem:[#allocation8 + $0x388] ss:$16 sps:$4 sm:$0xff]   ;;  %v2476_v49 = vld [vmem:[#allocation8 + $0x3a4] ss:$16 sps:$4 sm:$0xff]  }
 0x212   : > { %v2479_v50 = vld [vmem:[#allocation8 + $0x3ac] ss:$16 sps:$4 sm:$0xff]   ;;  %v2474_v51 = vld [vmem:[#allocation8 + $0x3a0] ss:$16 sps:$4 sm:$0xff]   ;;  %v2477_v52 = vld [vmem:[#allocation8 + $0x3a8] ss:$16 sps:$4 sm:$0xff]  }
 0x213   : > { %1358 = vmatprep.mubr.bf16.mxu0 %v533_v54  ;;  %1440 = vmatprep.mubr.bf16.mxu1 %v533_v54  ;;  %v405_v53 = vsub.s32 2, %v2982_v9  ;;  %v2482_v54 = vld [vmem:[#allocation8 + $0x3c4] ss:$16 sps:$4 sm:$0xff]  }
 0x214   : > { %1359 = vmatmul.mubr.bf16.vlgmr.msra.gmra.mrb[4].mxu0 %v532_v57  ;;  %1441 = vmatmul.mubr.bf16.vlgmr.msra.gmra.mrb[4].mxu1 %v532_v57  ;;  %v2483_v57 = vld [vmem:[#allocation8 + $0x3c8] ss:$16 sps:$4 sm:$0xff]  }
 0x215   : > { %1368 = vmatpush1.bf16.msra.mxu0 %v2396_v55  ;;  %1450 = vmatpush1.bf16.msra.mxu1 %v2399_v56  ;;  %v2485_v55 = vld [vmem:[#allocation8 + $0x3cc] ss:$16 sps:$4 sm:$0xff]   ;;  %v2480_v56 = vld [vmem:[#allocation8 + $0x3c0] ss:$16 sps:$4 sm:$0xff]  }
 0x216   : > { %1369 = vmatprep.subr.bf16.mxu0 %v2404_v58  ;;  %1451 = vmatprep.subr.bf16.mxu1 %v2407_v59  ;;  %v406_v58 = vrot.slane %v2995_v37, %v405_v53  ;;  %v2488_v59 = vld [vmem:[#allocation8 + $0x3e4] ss:$16 sps:$4 sm:$0xff]   ;;  %v2496_v37 = vld [vmem:[#allocation9 + $0x48] sm:$0xff]  }
 0x217   : > { %1399 = vmatprep.mubr.bf16.mxu0 %v535_v60  ;;  %1481 = vmatprep.mubr.bf16.mxu1 %v535_v60  ;;  %v2491_v60 = vld [vmem:[#allocation8 + $0x3ec] ss:$16 sps:$4 sm:$0xff]  }
 0x219   : > { %1370 = vmatpush1.bf16.msra.mxu0 %v2402_v61  ;;  %1452 = vmatpush1.bf16.msra.mxu1 %v2405_v62  ;;  %v2486_v61 = vld [vmem:[#allocation8 + $0x3e0] ss:$16 sps:$4 sm:$0xff]   ;;  %v2489_v62 = vld [vmem:[#allocation8 + $0x3e8] ss:$16 sps:$4 sm:$0xff]  }
 0x21a   : > { %1371 = vmatprep.subr.bf16.mxu0 %v2410_v63  ;;  %1453 = vmatprep.subr.bf16.mxu1 %v2413_v0  ;;  %v526_v63 = vadd.f32 %v3008_v44, %v406_v58  ;;  %v2492_v0 = vld [vmem:[#allocation9 + $0x40] sm:$0xff]   ;;  %v2500_v44 = vld [vmem:[#allocation9 + $0x50] sm:$0xff]  }
 0x21d   : > { %1372 = vmatpush1.bf16.msra.mxu0 %v2408_v1  ;;  %1454 = vmatpush1.bf16.msra.mxu1 %v2411_v2  ;;  %v2493_v1 = vld [vmem:[#allocation9 + $0xc0] sm:$0xff]  }
 0x21e   : > { %1373 = vmatprep.subr.bf16.mxu0 %v2416_v3  ;;  %1455 = vmatprep.subr.bf16.mxu1 %v2419_v4  ;;  %v2494_v2 = vld [vmem:[#allocation9] sm:$0xff]   ;;  %v534_v4 = vpack.c.bf16 %v526_v63, %v526_v63 }
 0x21f   : > { %v2495_v3 = vld [vmem:[#allocation9 + $0x80] sm:$0xff]  }
 0x221   : > { %1374 = vmatpush1.bf16.msra.mxu0 %v2414_v5  ;;  %1456 = vmatpush1.bf16.msra.mxu1 %v2417_v6  ;;  %v2497_v5 = vld [vmem:[#allocation9 + $0xc8] sm:$0xff]  }
 0x222   : > { %1375 = vmatprep.subr.bf16.mxu0 %v2422_v7  ;;  %1457 = vmatprep.subr.bf16.mxu1 %v2425_v8  ;;  %v2498_v6 = vld [vmem:[#allocation9 + $0x8] sm:$0xff]   ;;  %v2501_v8 = vld [vmem:[#allocation9 + $0xd0] sm:$0xff]  }
 0x223   : > { %v2499_v7 = vld [vmem:[#allocation9 + $0x88] sm:$0xff]  }
 0x225   : > { %1376 = vmatpush1.bf16.msra.mxu0 %v2420_v10  ;;  %1458 = vmatpush1.bf16.msra.mxu1 %v2423_v11  ;;  %v2502_v10 = vld [vmem:[#allocation9 + $0x10] sm:$0xff]  }
 0x226   : > { %1377 = vmatprep.subr.bf16.mxu0 %v2428_v12  ;;  %1459 = vmatprep.subr.bf16.mxu1 %v2431_v13  ;;  %v2503_v11 = vld [vmem:[#allocation9 + $0x90] sm:$0xff]   ;;  %v2504_v12 = vld [vmem:[#allocation9 + $0x58] sm:$0xff]  }
 0x227   : > { %v2505_v13 = vld [vmem:[#allocation9 + $0xd8] sm:$0xff]  }
 0x229   : > { %1378 = vmatpush1.bf16.msra.mxu0 %v2426_v14  ;;  %1460 = vmatpush1.bf16.msra.mxu1 %v2429_v15  ;;  %v2506_v14 = vld [vmem:[#allocation9 + $0x18] sm:$0xff]  }
 0x22a   : > { %1379 = vmatprep.subr.bf16.mxu0 %v2434_v16  ;;  %1461 = vmatprep.subr.bf16.mxu1 %v2437_v17  ;;  %v2507_v15 = vld [vmem:[#allocation9 + $0x98] sm:$0xff]   ;;  %v2508_v16 = vld [vmem:[#allocation9 + $0x60] sm:$0xff]  }
 0x22b   : > { %v2509_v17 = vld [vmem:[#allocation9 + $0xe0] sm:$0xff]  }
 0x22d   : > { %1380 = vmatpush1.bf16.msra.mxu0 %v2432_v18  ;;  %1462 = vmatpush1.bf16.msra.mxu1 %v2435_v19  ;;  %v2510_v18 = vld [vmem:[#allocation9 + $0x20] sm:$0xff]  }
 0x22e   : > { %1381 = vmatprep.subr.bf16.mxu0 %v2440_v20  ;;  %1463 = vmatprep.subr.bf16.mxu1 %v2443_v21  ;;  %v2511_v19 = vld [vmem:[#allocation9 + $0xa0] sm:$0xff]   ;;  %v2512_v20 = vld [vmem:[#allocation9 + $0x68] sm:$0xff]  }
 0x22f   : > { %v2513_v21 = vld [vmem:[#allocation9 + $0xe8] sm:$0xff]  }
 0x231   : > { %1382 = vmatpush1.bf16.msra.mxu0 %v2438_v22  ;;  %1464 = vmatpush1.bf16.msra.mxu1 %v2441_v23  ;;  %v2514_v22 = vld [vmem:[#allocation9 + $0x28] sm:$0xff]  }
 0x232   : > { %1383 = vmatprep.subr.bf16.mxu0 %v2446_v24  ;;  %1465 = vmatprep.subr.bf16.mxu1 %v2449_v25  ;;  %v2515_v23 = vld [vmem:[#allocation9 + $0xa8] sm:$0xff]   ;;  %v2516_v24 = vld [vmem:[#allocation9 + $0x70] sm:$0xff]  }
 0x233   : > { %v2517_v25 = vld [vmem:[#allocation9 + $0xf0] sm:$0xff]  }
 0x235   : > { %1384 = vmatpush1.bf16.msra.mxu0 %v2444_v26  ;;  %1466 = vmatpush1.bf16.msra.mxu1 %v2447_v27  ;;  %v2518_v26 = vld [vmem:[#allocation9 + $0x30] sm:$0xff]  }
 0x236   : > { %1385 = vmatprep.subr.bf16.mxu0 %v2452_v28  ;;  %1467 = vmatprep.subr.bf16.mxu1 %v2455_v29  ;;  %v2519_v27 = vld [vmem:[#allocation9 + $0xb0] sm:$0xff]   ;;  %v2520_v28 = vld [vmem:[#allocation9 + $0x78] sm:$0xff]  }
 0x237   : > { %v2521_v29 = vld [vmem:[#allocation9 + $0xf8] sm:$0xff]  }
 0x239   : > { %1386 = vmatpush1.bf16.msra.mxu0 %v2450_v30  ;;  %1468 = vmatpush1.bf16.msra.mxu1 %v2453_v31  ;;  %v2522_v30 = vld [vmem:[#allocation9 + $0x38] sm:$0xff]  }
 0x23a   : > { %1387 = vmatprep.subr.bf16.mxu0 %v2458_v32  ;;  %1469 = vmatprep.subr.bf16.mxu1 %v2461_v33  ;;  %v2523_v31 = vld [vmem:[#allocation9 + $0xb8] sm:$0xff]   ;;  %v664_v32 = vld [vmem:[%s3080_s4] sm:$0xf] }
 0x23b   : > { %v669_v33 = vrot.slane %v664_v32, %v397_v36 }
 0x23d   : > { %1388 = vmatpush1.bf16.msra.mxu0 %v2456_v34  ;;  %1470 = vmatpush1.bf16.msra.mxu1 %v2459_v35  ;;  %v677_v34 = vrot.slane %v664_v32, %v405_v53  ;;  %v673_v35 = vrot.slane %v664_v32, %v401_v38 }
 0x23e   : > { %1389 = vmatprep.subr.bf16.mxu0 %v2464_v40  ;;  %1471 = vmatprep.subr.bf16.mxu1 %v2467_v41  ;;  %v681_v40 = vrot.slane %v664_v32, %v409_v39 }
 0x241   : > { %1390 = vmatpush1.bf16.msra.mxu0 %v2462_v42  ;;  %1472 = vmatpush1.bf16.msra.mxu1 %v2465_v43 }
 0x242   : > { %1391 = vmatprep.subr.bf16.mxu0 %v2470_v45  ;;  %1473 = vmatprep.subr.bf16.mxu1 %v2473_v46 }
 0x245   : > { %1392 = vmatpush1.bf16.msra.mxu0 %v2468_v47  ;;  %1474 = vmatpush1.bf16.msra.mxu1 %v2471_v48 }
 0x246   : > { %1393 = vmatprep.subr.bf16.mxu0 %v2476_v49  ;;  %1475 = vmatprep.subr.bf16.mxu1 %v2479_v50 }
 0x249   : > { %1394 = vmatpush1.bf16.msra.mxu0 %v2474_v51  ;;  %1476 = vmatpush1.bf16.msra.mxu1 %v2477_v52 }
 0x24a   : > { %1395 = vmatprep.subr.bf16.mxu0 %v2482_v54  ;;  %1477 = vmatprep.subr.bf16.mxu1 %v2485_v55 }
 0x24d   : > { %1396 = vmatpush1.bf16.msra.mxu0 %v2480_v56  ;;  %1478 = vmatpush1.bf16.msra.mxu1 %v2483_v57 }
 0x24e   : > { %1397 = vmatprep.subr.bf16.mxu0 %v2488_v59  ;;  %1479 = vmatprep.subr.bf16.mxu1 %v2491_v60  ;;  %v2104_v60 = vld [vmem:[%s3082_s6] ss:$0 sm:$0xff] }
 0x251   : > { %1398 = vmatpush1.bf16.msra.mxu0 %v2486_v61  ;;  %1480 = vmatpush1.bf16.msra.mxu1 %v2489_v62 }
 0x252   : > { %2141 = vmatprep.subr.bf16.mxu0 %v2492_v0  ;;  %2163 = vmatprep.subr.bf16.mxu1 %v2493_v1 }
 0x254   : > { %1400 = vmatmul.mubr.bf16.vlgmr.msra.gmra.mrb[4].mxu0 %v534_v4  ;;  %1482 = vmatmul.mubr.bf16.vlgmr.msra.gmra.mrb[4].mxu1 %v534_v4 }
 0x255   : > { %2142 = vmatpush3.bf16.msra.mxu0 %v2494_v2  ;;  %2164 = vmatpush3.bf16.msra.mxu1 %v2495_v3 }
 0x256   : > { %2143 = vmatprep.subr.bf16.mxu0 %v2496_v37  ;;  %2165 = vmatprep.subr.bf16.mxu1 %v2497_v5 }
 0x259   : > { %2144 = vmatpush3.bf16.msra.mxu0 %v2498_v6  ;;  %2166 = vmatpush3.bf16.msra.mxu1 %v2499_v7 }
 0x25a   : > { %2145 = vmatprep.subr.bf16.mxu0 %v2500_v44  ;;  %2167 = vmatprep.subr.bf16.mxu1 %v2501_v8 }
 0x25d   : > { %2146 = vmatpush3.bf16.msra.mxu0 %v2502_v10  ;;  %2168 = vmatpush3.bf16.msra.mxu1 %v2503_v11 }
 0x25e   : > { %2147 = vmatprep.subr.bf16.mxu0 %v2504_v12  ;;  %2169 = vmatprep.subr.bf16.mxu1 %v2505_v13 }
 0x261   : > { %2148 = vmatpush3.bf16.msra.mxu0 %v2506_v14  ;;  %2170 = vmatpush3.bf16.msra.mxu1 %v2507_v15 }
 0x262   : > { %2149 = vmatprep.subr.bf16.mxu0 %v2508_v16  ;;  %2171 = vmatprep.subr.bf16.mxu1 %v2509_v17 }
 0x265   : > { %2150 = vmatpush3.bf16.msra.mxu0 %v2510_v18  ;;  %2172 = vmatpush3.bf16.msra.mxu1 %v2511_v19 }
 0x266   : > { %2151 = vmatprep.subr.bf16.mxu0 %v2512_v20  ;;  %2173 = vmatprep.subr.bf16.mxu1 %v2513_v21 }
 0x269   : > { %2152 = vmatpush3.bf16.msra.mxu0 %v2514_v22  ;;  %2174 = vmatpush3.bf16.msra.mxu1 %v2515_v23 }
 0x26a   : > { %2153 = vmatprep.subr.bf16.mxu0 %v2516_v24  ;;  %2175 = vmatprep.subr.bf16.mxu1 %v2517_v25 }
 0x26d   : > { %2154 = vmatpush3.bf16.msra.mxu0 %v2518_v26  ;;  %2176 = vmatpush3.bf16.msra.mxu1 %v2519_v27 }
 0x26e   : > { %2155 = vmatprep.subr.bf16.mxu0 %v2520_v28  ;;  %2177 = vmatprep.subr.bf16.mxu1 %v2521_v29 }
 0x271   : > { %2156 = vmatpush3.bf16.msra.mxu0 %v2522_v30  ;;  %2178 = vmatpush3.bf16.msra.mxu1 %v2523_v31 }
 0x327   : > { %v1401_v41 = vpop.f32.mrb[4].mxu0  ;;  %v1483_v42 = vpop.f32.mrb[4].mxu1 }
 0x328   : > { %v2185_v43 = vadd.f32 %v1401_v41, %v669_v33  ;;  %v2187_v45 = vadd.f32 %v1483_v42, %v677_v34  ;;  %v1403_v46 = vpop.f32.mrb[5].mxu0  ;;  %v1485_v47 = vpop.f32.mrb[5].mxu1 }
 0x329   : > { %v2186_v48 = vadd.f32 %v1403_v46, %v673_v35  ;;  %v2188_v49 = vadd.f32 %v1485_v47, %v681_v40  ;;  %v1405_v50 = vpop.f32.mrb[6].mxu0  ;;  %v1487_v51 = vpop.f32.mrb[6].mxu1 }
 0x32a   : > { %v1490_v36 = vmax.f32 %v2185_v43, 0.0  ;;  %v1492_v52 = vmax.f32 %v2187_v45, 0.0  ;;  %v1406_v54 = vpop.f32.mrb[7].mxu0  ;;  %v1488_v53 = vpop.f32.mrb[7].mxu1 }
 0x32b   : > { %v1491_v55 = vmax.f32 %v2186_v48, 0.0  ;;  %v1493_v56 = vmax.f32 %v2188_v49, 0.0 }
 0x32c   : > { %v1494_v9 = vpack.c.bf16 %v1490_v36, %v1490_v36  ;;  %v1496_v39 = vpack.c.bf16 %v1492_v52, %v1492_v52 }
 0x32d   : > { %v1495_v38 = vpack.c.bf16 %v1491_v55, %v1491_v55  ;;  %v1497_v57 = vpack.c.bf16 %v1493_v56, %v1493_v56 }
 0x32f   : > { %1793 = vmatprep.mubr.bf16.mxu0 %v1495_v38  ;;  %1833 = vmatprep.mubr.bf16.mxu1 %v1497_v57 }
 0x330   : > { %1794 = vmatmul.mubr.bf16.vlgmr.msra.gmra.mrb[8].mxu0 %v1494_v9  ;;  %1834 = vmatmul.mubr.bf16.vlgmr.msra.gmra.mrb[8].mxu1 %v1496_v39 }
 0x403   : > { %v2157_v58 = vpop.f32.mrb[8].mxu0  ;;  %v2179_v59 = vpop.f32.mrb[8].mxu1 }
 0x404   : > { %v2158_v61 = vpop.f32.mrb[9].mxu0  ;;  %v2180_v62 = vpop.f32.mrb[9].mxu1 }
 0x405   : > { %v2159_v63 = vadd.f32 %v2158_v61, %v2157_v58  ;;  %v2181_v0 = vadd.f32 %v2180_v62, %v2179_v59  ;;  %v2160_v1 = vpop.f32.mrb[10].mxu0  ;;  %v2182_v2 = vpop.f32.mrb[10].mxu1 }
 0x406   : > { %v2161_v3 = vpop.f32.mrb[11].mxu0  ;;  %v2183_v4 = vpop.f32.mrb[11].mxu1 }
 0x407   : > { %v1796_v37 = vadd.f32 %v2159_v63, %v2104_v60 }
 0x409   : > { %v1836_v5 = vadd.f32 %v2181_v0, %v1796_v37 }
 0x40b   : > { %v1841_v6 = vmul.f32 %v1836_v5, %v1836_v5 }
 0x40d   : > { %v1842_v7 = vsel %vm437_vm4, %v1841_v6, 0.0 }
 0x40e   : > { %1843 = vadd.xlane.f32.xlu0 %v1842_v7 }
 0x49b   : > { %v1844_v44 = vpop.xlane.xlu0 %1843 }
 0x49c   : > { %2524 = vrsqrt.f32 %v1844_v44  ;;  %vm1847_vm6 = vcmp.eq.f32.partialorder %v1844_v44, inf  ;;  %v1850_v11 = vand.u32 2147483648, %v1844_v44  ;;  %vm1849_vm7 = vcmp.eq.f32.partialorder %v1844_v44, 0.0 }
 0x4a6   : > { %v2525_v8 = vpop.eup %2524 }
 0x4a7   : > { %v1846_v10 = vmul.f32 %v2525_v8, %v1844_v44 }
 0x4a9   : > { %v1848_v12 = vsel %vm1847_vm6, %v1844_v44, %v1846_v10 }
 0x4aa   : > { %v1851_v13 = vsel %vm1849_vm7, %v1850_v11, %v1848_v12 }
 0x4ab   : > { %v1852_v14 = vmax.f32 %v1851_v13, 1e-12 }
 0x4ad   : > { %2526 = vrcp.f32 %v1852_v14 }
 0x4b7   : > { %v2527_v15 = vpop.eup %2526 }
 0x4b8   : > { %v1854_v16 = vmul.f32 %v2527_v15, %v1836_v5 }
 0x4ba   : > { %1855 = vst [vmem:[#allocation11] sm:$0x3] %v1854_v16 }
 0x4bb PF: > { %s3104_s13 = sadd.s32 4294967295, %s2730_s29   ;;  %s2745_s1 = smov [#allocation11]  }
 0x4bc   : > { %p3032_p6 = scmp.eq.s32.totalorder %s3104_s13, 1  ;;  %s1865_s14 = sshll.u32 %s2745_s1, 4  ;;  %s1866_s14 = int_to_ptr.vmem [resolvable:$true] %s1865_s14 }
 0x4bd   : > { %s2642_s18 = scalar_lea.vmem %s1866_s14, 32  ;;  %p2649_p11 = scmp.lt.s32.totalorder %s1866_s14, %s1866_s14 }
 0x4be   : > { %p2643_p9 = scmp.ne.s32.totalorder %s1866_s14, %s2642_s18  ;;  %p2650_p13 = scmp.lt.s32.totalorder %s2642_s18, %s2642_s18 }
 0x4c0   : > { %p2644_p10 = pnand %p2643_p9, %p3032_p6  ;;  %p2651_p7 = por %p2650_p13, %p2649_p11 }
 0x4c2   : > { %p2645_p0 = pneg %p2644_p10 }
 0x4c4   : > { %p2652_p12 = pnand %p2651_p7, %p2645_p0 }
 0x4c6   : > { %2655 = shalt.err (!%p2652_p12)
}
 0x4c7   : > { %s3106_s7 = sld [smem:[#allocation17_spill]] }
 0x4cd   : > { %s2656_s22 = scalar_lea.hbm %s3106_s7, 32 }
 0x4ce   : > { %p2657_p2 = scmp.ne.s32.totalorder %s3106_s7, %s2656_s22  ;;  %p2662_p4 = scmp.lt.u32.totalorder %s2656_s22, %s3106_s7 }
 0x4d0   : > { %p2658_p3 = pnand %p2657_p2, %p3032_p6 }
 0x4d2   : > { %p2659_p8 = pneg %p2658_p3 }
 0x4d4   : > { %p2664_p1 = pnand %p2662_p4, %p2659_p8 }
 0x4d6   : > { %2667 = shalt.err (!%p2664_p1)
}
 0x4d7   : > { %2212 = dma.vmem_to_hbm [thread:$0]  (%p3032_p6), %s1866_s14, 32, %s3106_s7, [#allocation5]  }
 0x4d8   : > { %2705 = dma.done.wait (%p3032_p6), [#allocation5], 32  }
 0x4d9   : > { %2707 = vsyncadd (%p3032_p6), [#allocation5], 4294967264 }
 0x4da PF: > { %s23_s29 = sadd.s32 1, %s2730_s29   ;;  %s3107_s24 = smov %s2714_s25 }
 0x4db   : > { %p20_p5 = scmp.ge.s32.totalorder %s23_s29, 4   ;;  %s3108_s25 = smov %s2718_s26 }
 0x4dc   : > { %s3109_s26 = smov %s2935_s15  ;;  %s3110_s27 = smov %s2726_s28 }
 0x4dd   : > { %s3111_s28 = smov %s3113_s17  ;;  %22 = sbr.rel (!%p20_p5) target bundleno = 10 (0xa), region = 106 }
 0x4e4   :  { %1878 = vsyncpa [#allocation4], 1 }
 0x4e5   :  { %1880 = vsyncpa [#allocation4 + $0x1], 1 }
 0x4e6   :  { %1881 = vsyncpa [#allocation7], 1 }
 0x4e7   :  { %1882 = vsyncpa [#allocation10], 1 }
 0x4e8   :  { %1883 = vsyncpa [#allocation5], 1 }
 0x4e9   :  { %1885 = vsyncpa [#allocation5 + $0x1], 1 }

</bundles_post_ra>
